<compile_context>
chip_gen: v5e
topology: v5e:2x2
jax: 0.10.0
libtpu: 0.0.40
codegen_flags: <defaults>
</compile_context>

<pallas_src>
import numpy as np
import jax
import jax.numpy as jnp
from jax.experimental import pallas as pl
from jax.experimental.pallas import tpu as pltpu


_VMEM_PIPELINE_BUDGET = 12 << 20   # 2x-buffered in+out blocks kept under v5e's 16 MiB default scoped VMEM
_TARGET_STEP_BYTES = 2 << 20       # ~2 MiB written per grid step (copy kernels plateau ~85% of HBM roofline)
_MAX_LANE = 8192                   # cap lane width of the flattened view (bounds the minimum block size)


def _broadcast_kernel(x_ref, o_ref):
    # x_ref: (TN, L) input tile.  o_ref: (multiply, TN, L): all replicas in one grid step.
    v = x_ref[...]
    for m in range(o_ref.shape[0]):   # static unroll; same vregs stored `multiply` times
        o_ref[m] = v


def _per_replica_kernel(x_ref, o_ref):
    # x_ref: (TN, L) input tile (resident across the innermost multiply axis).
    # o_ref: (TN, L) slot for replica m (leading replica dim squeezed away).
    o_ref[...] = x_ref[...]


def _lane_dense_view(N, H, W, itemsize):
    """Pick a 2-D (rows, L) view of the (N,H,W) slab with L a large multiple of 128
    (unmasked stores) while keeping rows >= the sublane granule when possible."""
    total = N * H * W
    sub = max(8, 32 // itemsize)
    if total % 128 == 0:
        L = 128
        while total % (L * 2) == 0 and L * 2 <= _MAX_LANE and total // (L * 2) >= sub:
            L *= 2
        return total // L, L
    # TODO(synk): total not divisible by 128 -> masked partial stores; correct but slower fallback.
    return N, H * W


def _round_tn(tn, rows, sub):
    """Row-tile size satisfying the BlockSpec sublane rule: multiple of `sub` or the full extent."""
    if tn >= rows:
        return rows
    tn = max(sub, (tn // sub) * sub)
    return rows if tn >= rows else tn


def tile_batches(x, multiply: int):
    """(N, H, W) -> (multiply * N, H, W) replicated along axis 0 (torch .repeat(multiply,1,1))."""
    x = jnp.asarray(x)
    N, H, W = x.shape
    if multiply <= 1:
        return x  # identity: skip the HBM round trip entirely

    itemsize = x.dtype.itemsize
    sub = max(8, 32 // itemsize)          # sublane packing granule: 8 f32 / 16 bf16 / 32 i8
    rows, L = _lane_dense_view(N, H, W, itemsize)
    row_bytes = L * itemsize
    x2 = x.reshape(rows, L)               # contiguous reshape: layout plumbing, no data movement

    min_tn = min(rows, sub)
    total_bytes = (1 + multiply) * rows * L * itemsize
    bcast_min_pipe = 2 * (1 + multiply) * min_tn * row_bytes

    if multiply <= 8 and bcast_min_pipe <= _VMEM_PIPELINE_BUDGET:
        # --- single-step-per-tile path: write all replicas in one grid step ---
        tn = _round_tn(max(1, _TARGET_STEP_BYTES // (multiply * row_bytes)), rows, sub)
        while tn > min_tn and 2 * (1 + multiply) * tn * row_bytes > _VMEM_PIPELINE_BUDGET:
            tn = _round_tn(tn // 2, rows, sub)
        n_blocks = pl.cdiv(rows, tn)
        out3 = pl.pallas_call(
            _broadcast_kernel,
            out_shape=jax.ShapeDtypeStruct((multiply, rows, L), x.dtype),
            grid_spec=pltpu.PrefetchScalarGridSpec(
                num_scalar_prefetch=0,
                grid=(n_blocks,),
                in_specs=[pl.BlockSpec((tn, L), lambda n: (n, 0))],
                out_specs=pl.BlockSpec((multiply, tn, L), lambda n: (0, n, 0)),
            ),
            compiler_params=pltpu.CompilerParams(
                dimension_semantics=("parallel",),
            ),
            cost_estimate=pl.CostEstimate(
                flops=0, transcendentals=0, bytes_accessed=total_bytes,
            ),
        )(x2)
    else:
        # --- per-replica path for large multiply: 2-D grid, multiply innermost ---
        # Input block index depends only on n -> tile stays VMEM-resident across m.
        # Every (n, m) output block is written exactly once -> both axes "parallel"
        # (v7x megacore can shard either axis; no-op on single-TC v5e/v6e).
        tn = _round_tn(max(1, _TARGET_STEP_BYTES // row_bytes), rows, sub)
        while tn > min_tn and 4 * tn * row_bytes > _VMEM_PIPELINE_BUDGET:
            tn = _round_tn(tn // 2, rows, sub)
        n_blocks = pl.cdiv(rows, tn)
        out3 = pl.pallas_call(
            _per_replica_kernel,
            out_shape=jax.ShapeDtypeStruct((multiply, rows, L), x.dtype),
            grid_spec=pltpu.PrefetchScalarGridSpec(
                num_scalar_prefetch=0,
                grid=(n_blocks, multiply),
                in_specs=[pl.BlockSpec((tn, L), lambda n, m: (n, 0))],
                out_specs=pl.BlockSpec((None, tn, L), lambda n, m: (m, n, 0)),
            ),
            compiler_params=pltpu.CompilerParams(
                dimension_semantics=("parallel", "parallel"),
            ),
            cost_estimate=pl.CostEstimate(
                flops=0, transcendentals=0, bytes_accessed=total_bytes,
            ),
        )(x2)

    return out3.reshape(multiply * N, H, W)


def concat_batches(data: dict, multiply: int = 1) -> dict:
    """JAX/Pallas equivalent of ConcatBatches.forward.

    data: {key: List[List[array(H, W)]]}  ->  {key: array(multiply * N, H, W)}
    """
    out = {}
    for k, v in data.items():
        flat = [a for inner in v for a in inner]          # ravel (Python glue)
        if flat and all(isinstance(a, np.ndarray) for a in flat):
            stacked = np.stack(flat, axis=0)              # host stack: single H2D transfer, no extra HBM round trip
        else:
            stacked = jnp.stack([jnp.asarray(a) for a in flat], axis=0)
        out[k] = tile_batches(stacked, multiply)          # (multiply * N, H, W)
    return out


if __name__ == "__main__":
    key = jax.random.PRNGKey(0)
    multiply = 3
    H, W = 16, 16

    k1, k2 = jax.random.split(key)
    # Nested List[List[np.ndarray(H, W)]] per key, as the torch module expects.
    feats_a = [
        [np.asarray(jax.random.normal(jax.random.fold_in(k1, i * 10 + j), (H, W), jnp.float32))
         for j in range(2)]
        for i in range(2)
    ]  # 2 x 2 -> N = 4
    feats_b = [
        [np.asarray(jax.random.normal(jax.random.fold_in(k2, i * 10 + j), (H, W), jnp.float32))
         for j in range(3)]
        for i in range(1)
    ]  # 1 x 3 -> N = 3

    data = {"a": feats_a, "b": feats_b}

    result = concat_batches(data, multiply=multiply)
    for v_ in result.values():
        jax.block_until_ready(v_)

    # Reference check (numpy tile == torch .repeat(multiply, 1, 1)).
    for k, v in data.items():
        flat = [np.asarray(a) for inner in v for a in inner]
        ref = np.tile(np.stack(flat, axis=0), (multiply, 1, 1))
        assert result[k].shape == ref.shape, (result[k].shape, ref.shape)
        assert result[k].dtype == ref.dtype
        assert np.allclose(np.asarray(result[k]), ref), f"mismatch for key {k}"

    # Exercise the per-replica (large multiply) path too.
    big = concat_batches({"a": feats_a}, multiply=12)
    jax.block_until_ready(big["a"])
    flat_a = [np.asarray(a) for inner in feats_a for a in inner]
    ref_big = np.tile(np.stack(flat_a, axis=0), (12, 1, 1))
    assert np.allclose(np.asarray(big["a"]), ref_big), "mismatch (multiply=12)"

    # multiply=1 short-circuit path.
    result1 = concat_batches(data, multiply=1)
    for k, v in data.items():
        flat = [np.asarray(a) for inner in v for a in inner]
        assert np.allclose(np.asarray(result1[k]), np.stack(flat, axis=0)), f"mismatch {k} (multiply=1)"

    print("KERNEL_OK")
</pallas_src>

<mosaic_0001>
module attributes {stable_mosaic.version = 11 : i64} {
  func.func @_broadcast_kernel(%arg0: i32, %arg1: memref<8x128xf32, #tpu.memory_space<vmem>>, %arg2: memref<3x8x128xf32, #tpu.memory_space<vmem>>) attributes {dimension_semantics = [#tpu.dimension_semantics<parallel>], iteration_bounds = array<i64: 1>, scalar_prefetch = 0 : i64, scratch_operands = 0 : i64, tpu.core_type = #tpu.core_type<tc>, window_params = [{transform_indices = @transform_0, window_bounds = array<i64: 8, 128>}, {transform_indices = @transform_1, window_bounds = array<i64: 3, 8, 128>}]} {
    %c0 = arith.constant 0 : index
    %c0_0 = arith.constant 0 : index
    %0 = vector.load %arg1[%c0, %c0_0] : memref<8x128xf32, #tpu.memory_space<vmem>>, vector<8x128xf32>
    %c0_1 = arith.constant 0 : index
    %c0_2 = arith.constant 0 : index
    %c0_3 = arith.constant 0 : index
    %1 = vector.load %arg2[%c0_1, %c0_2, %c0_3] : memref<3x8x128xf32, #tpu.memory_space<vmem>>, vector<1x8x128xf32>
    %2 = vector.shape_cast %1 : vector<1x8x128xf32> to vector<8x128xf32>
    %3 = vector.shape_cast %0 : vector<8x128xf32> to vector<1x8x128xf32>
    tpu.vector_store %arg2[%c0_1, %c0_2, %c0_3], %3 {strides = array<i32>} : memref<3x8x128xf32, #tpu.memory_space<vmem>>, vector<1x8x128xf32>,
    %c1 = arith.constant 1 : index
    %c0_4 = arith.constant 0 : index
    %c0_5 = arith.constant 0 : index
    %4 = vector.load %arg2[%c1, %c0_4, %c0_5] : memref<3x8x128xf32, #tpu.memory_space<vmem>>, vector<1x8x128xf32>
    %5 = vector.shape_cast %4 : vector<1x8x128xf32> to vector<8x128xf32>
    %6 = vector.shape_cast %0 : vector<8x128xf32> to vector<1x8x128xf32>
    tpu.vector_store %arg2[%c1, %c0_4, %c0_5], %6 {strides = array<i32>} : memref<3x8x128xf32, #tpu.memory_space<vmem>>, vector<1x8x128xf32>,
    %c2 = arith.constant 2 : index
    %c0_6 = arith.constant 0 : index
    %c0_7 = arith.constant 0 : index
    %7 = vector.load %arg2[%c2, %c0_6, %c0_7] : memref<3x8x128xf32, #tpu.memory_space<vmem>>, vector<1x8x128xf32>
    %8 = vector.shape_cast %7 : vector<1x8x128xf32> to vector<8x128xf32>
    %9 = vector.shape_cast %0 : vector<8x128xf32> to vector<1x8x128xf32>
    tpu.vector_store %arg2[%c2, %c0_6, %c0_7], %9 {strides = array<i32>} : memref<3x8x128xf32, #tpu.memory_space<vmem>>, vector<1x8x128xf32>,
    return
  }
  func.func @transform_0(%arg0: i32) -> (i32, i32) {
    %c0_i32 = arith.constant 0 : i32
    %c0_i32_0 = arith.constant 0 : i32
    return %arg0, %c0_i32 : i32, i32
  }
  func.func @transform_1(%arg0: i32) -> (i32, i32, i32) {
    %c0_i32 = arith.constant 0 : i32
    %c0_i32_0 = arith.constant 0 : i32
    %c0_i32_1 = arith.constant 0 : i32
    return %c0_i32, %arg0, %c0_i32_0 : i32, i32, i32
  }
}

</mosaic_0001>

<bundles_post_ra>
// kernel: tpu_custom_call.1
= control target key start
LH: loop header
LB: loop body
LE: loop exit
PB: predicated region body
PF: predicated region fallthrough
CT: control target
= control target key end

     0   :  { %6 = vsyncpa [#allocation3], 0  ;;  %s124_s0 = inlined_call_operand.hbm [shape: f32[8,128], index: 0, kind: input, shape index: {}]   ;;  %s125_s1 = inlined_call_operand.hbm [shape: f32[3,8,128], index: 1, kind: output, shape index: {}]  }
   0x1   :  { %7 = vsyncpa [#allocation4], 0  ;;  %s13_s8 = sshll.u32 %s124_s0, 4  ;;  %s104_s9 = smov [#allocation2]   ;;  %s14_s8 = int_to_ptr.hbm [resolvable:$true] %s13_s8 }
   0x2   :  { %s15_s10 = sshll.u32 %s104_s9, 4  ;;  %s16_s10 = int_to_ptr.vmem [resolvable:$true] %s15_s10 }
   0x3   :  { %18 = dma.hbm_to_vmem [thread:$0]  %s14_s8, 128, %s16_s10, [#allocation3]  }
   0x4   :  { %100 = dma.done.wait [#allocation3], 128  }
   0x5   :  { %101 = vsyncadd [#allocation3], 4294967168  ;;  %s105_s11 = smov [#allocation5]   ;;  %s35_s15 = sshll.u32 %s125_s1, 4  ;;  %v23_v0 = vld [vmem:[#allocation2] sm:$0xff]  ;;  %s36_s15 = int_to_ptr.hbm [resolvable:$true] %s35_s15 }
   0x6   :  { %s33_s12 = sshll.u32 %s105_s11, 4  ;;  %24 = vst [vmem:[#allocation5] sm:$0xff] %v23_v0  ;;  %s106_s0 = smov 128   ;;  %s34_s12 = int_to_ptr.vmem [resolvable:$true] %s33_s12 }
   0x7   :  { %26 = vst [vmem:[#allocation5 + $0x8] sm:$0xff] %v23_v0  ;;  %s107_s16 = smov 8  }
   0x8   :  { %28 = vst [vmem:[#allocation5 + $0x10] sm:$0xff] %v23_v0 }
   0x9   :  { %41 = dma.vmem_to_hbm [thread:$0]  %s34_s12, 384, %s36_s15, [#allocation4], %s106_s0, %s106_s0, %s107_s16  }
   0xa   :  { %102 = dma.done.wait [#allocation4], 384  }
   0xb   :  { %103 = vsyncadd [#allocation4], 4294966912 }
   0xc   :  { %46 = vsyncpa [#allocation3], 1 }
   0xd   :  { %47 = vsyncpa [#allocation4], 1 }

</bundles_post_ra>
